<compile_context>
chip_gen: v6e
topology: v6e:2x2x1
jax: 0.10.0
libtpu: 0.0.40
codegen_flags: <defaults>
</compile_context>

<pallas_src>
import functools

import jax
import jax.numpy as jnp
from jax.experimental import pallas as pl
from jax.experimental.pallas import tpu as pltpu


# ----------------------------------------------------------------------------
# Pallas kernel: whole ResidualStack for one batch element per grid step
# ----------------------------------------------------------------------------
def _res_stack_kernel(*refs, H, layer_has_match, final_relu):
    """Fused ResidualStack forward for one batch element.

    refs layout (in order):
      refs[0]   : x_ref  (1, H, W*Cin)    lane-dense activation rows
      per layer : M1 (3, W*Ci, W*Cr), b1 (1, W*Cr),
                  M2 (3, W*Cr, W*Co), b2 (1, W*Co),
                  [Mm (W*Ci, W*Co), bm (1, W*Co)]   if channel_match
      refs[-1]  : o_ref  (1, H, W*Cout)
    """
    x_ref, o_ref = refs[0], refs[-1]
    wrefs = refs[1:-1]

    def conv3x3_rows(inp, m_ref, b_ref):
        # inp: (H, W*Ci), already ReLU'd.  Returns (H, W*Co) in f32.
        # Height halo: two zero rows; width halo is baked into the band matrix.
        z = jnp.zeros((1, inp.shape[1]), jnp.float32)
        xp = jnp.concatenate([z, inp, z], axis=0)                 # (H+2, W*Ci)
        acc = jnp.dot(xp[0:H], m_ref[0], preferred_element_type=jnp.float32)
        acc = acc + jnp.dot(xp[1:H + 1], m_ref[1],
                            preferred_element_type=jnp.float32)
        acc = acc + jnp.dot(xp[2:H + 2], m_ref[2],
                            preferred_element_type=jnp.float32)
        return acc + b_ref[...]                                   # (1,W*Co) bcast

    x = x_ref[0].astype(jnp.float32)                              # (H, W*Cin)
    i = 0
    for has_match in layer_has_match:
        m1, b1, m2, b2 = wrefs[i], wrefs[i + 1], wrefs[i + 2], wrefs[i + 3]
        i += 4
        h = conv3x3_rows(jnp.maximum(x, 0.0), m1, b1)             # ReLU->conv1
        y = conv3x3_rows(jnp.maximum(h, 0.0), m2, b2)             # ReLU->conv2
        if has_match:
            mm, bm = wrefs[i], wrefs[i + 1]
            i += 2
            skip = jnp.dot(x, mm[...],
                           preferred_element_type=jnp.float32) + bm[...]
        else:
            skip = x
        x = y + skip
    if final_relu:
        x = jnp.maximum(x, 0.0)
    o_ref[0] = x.astype(o_ref.dtype)


# ----------------------------------------------------------------------------
# Plain-JAX weight re-packing (done once; tiny, weight-sized work)
# ----------------------------------------------------------------------------
def _band_weights(w_hwio, Wimg):
    """(3,3,Ci,Co) conv weights -> (3, W*Ci, W*Co) per-ky banded matrices.

    Row index  = w  * Ci + ci   (input column, input channel)
    Col index  = wp * Co + co   (output column, output channel)
    Entry      = w_hwio[ky, w - wp + 1, ci, co] when |w - wp| <= 1 else 0.
    The zero band outside |w - wp| <= 1 implements the width zero-padding.
    """
    _, _, Ci, Co = w_hwio.shape
    wi = jnp.arange(Wimg)
    kx = wi[:, None] - wi[None, :] + 1                      # (W, W)
    valid = (kx >= 0) & (kx <= 2)
    kx_c = jnp.clip(kx, 0, 2)
    m5 = w_hwio[:, kx_c]                                    # (3, W, W, Ci, Co)
    m5 = jnp.where(valid[None, :, :, None, None], m5, 0.0)
    m5 = m5.transpose(0, 1, 3, 2, 4)                        # (3, W, Ci, W, Co)
    return m5.reshape(3, Wimg * Ci, Wimg * Co)


def _block_diag_1x1(wm, Wimg):
    """(Ci,Co) 1x1-conv weights -> (W*Ci, W*Co) block-diagonal matrix."""
    Ci, Co = wm.shape
    eye = jnp.eye(Wimg, dtype=wm.dtype)
    m = eye[:, None, :, None] * wm[None, :, None, :]        # (W, Ci, W, Co)
    return m.reshape(Wimg * Ci, Wimg * Co)


def _bias_row(b, Wimg):
    return jnp.tile(b, Wimg).reshape(1, Wimg * b.shape[0])


# ----------------------------------------------------------------------------
# Wrapper: NCHW in/out, one fused pallas_call for the whole stack
# ----------------------------------------------------------------------------
def residual_stack_forward(x_nchw, params_list):
    """ResidualStack.forward: relu(ResBlock^L (x)), PyTorch NCHW in/out."""
    N, Cin, H, W = x_nchw.shape
    # NCHW -> NHWC, then merge (W, C) into the lane dim: (N, H, W*Cin).
    x = jnp.transpose(x_nchw, (0, 2, 3, 1)).reshape(N, H, W * Cin)

    in_specs = [pl.BlockSpec((1, H, W * Cin), lambda n: (n, 0, 0))]
    args = [x]
    layer_has_match = []
    cout = Cin
    for p in params_list:
        ci, cr = p["w1"].shape[2], p["w1"].shape[3]
        co = p["w2"].shape[3]
        m1 = _band_weights(p["w1"], W)
        m2 = _band_weights(p["w2"], W)
        args += [m1, _bias_row(p["b1"], W), m2, _bias_row(p["b2"], W)]
        in_specs += [
            pl.BlockSpec((3, W * ci, W * cr), lambda n: (0, 0, 0)),
            pl.BlockSpec((1, W * cr), lambda n: (0, 0)),
            pl.BlockSpec((3, W * cr, W * co), lambda n: (0, 0, 0)),
            pl.BlockSpec((1, W * co), lambda n: (0, 0)),
        ]
        has_match = "wm" in p
        if has_match:
            args += [_block_diag_1x1(p["wm"], W), _bias_row(p["bm"], W)]
            in_specs += [
                pl.BlockSpec((W * ci, W * co), lambda n: (0, 0)),
                pl.BlockSpec((1, W * co), lambda n: (0, 0)),
            ]
        layer_has_match.append(has_match)
        cout = co

    kernel = functools.partial(
        _res_stack_kernel, H=H,
        layer_has_match=tuple(layer_has_match), final_relu=True)

    out = pl.pallas_call(
        kernel,
        out_shape=jax.ShapeDtypeStruct((N, H, W * cout), x_nchw.dtype),
        grid=(N,),
        in_specs=in_specs,
        out_specs=pl.BlockSpec((1, H, W * cout), lambda n: (n, 0, 0)),
        compiler_params=pltpu.CompilerParams(
            dimension_semantics=("parallel",)),
    )(*args)
    return jnp.transpose(out.reshape(N, H, W, cout), (0, 3, 1, 2))


# ----------------------------------------------------------------------------
# Pure-JAX reference (for correctness check only)
# ----------------------------------------------------------------------------
def _conv_ref(x, w_hwio, b, padding):
    y = jax.lax.conv_general_dilated(
        x, w_hwio, window_strides=(1, 1), padding=padding,
        dimension_numbers=("NHWC", "HWIO", "NHWC"))
    return y + b.reshape(1, 1, 1, -1)


def residual_stack_reference(x_nchw, params_list):
    x = jnp.transpose(x_nchw, (0, 2, 3, 1))
    for p in params_list:
        h = _conv_ref(jax.nn.relu(x), p["w1"], p["b1"], "SAME")
        h = _conv_ref(jax.nn.relu(h), p["w2"], p["b2"], "SAME")
        skip = _conv_ref(x, p["wm"][None, None], p["bm"], "VALID") \
            if "wm" in p else x
        x = skip + h
    return jnp.transpose(jax.nn.relu(x), (0, 3, 1, 2))


# ----------------------------------------------------------------------------
# Deterministic parameter construction (shapes from ResBlock.__init__)
# ----------------------------------------------------------------------------
def make_params(key, in_channels, res_channels, out_channels, num_layers):
    params = []
    for _ in range(num_layers):
        key, k1, k2, k3, k4, k5, k6 = jax.random.split(key, 7)
        p = {
            # stored as HWIO (PyTorch OIHW -> kernel layout)
            "w1": 0.1 * jax.random.normal(
                k1, (3, 3, in_channels, res_channels), jnp.float32),
            "b1": 0.1 * jax.random.normal(k2, (res_channels,), jnp.float32),
            "w2": 0.1 * jax.random.normal(
                k3, (3, 3, res_channels, out_channels), jnp.float32),
            "b2": 0.1 * jax.random.normal(k4, (out_channels,), jnp.float32),
        }
        if in_channels != out_channels:
            p["wm"] = 0.1 * jax.random.normal(
                k5, (in_channels, out_channels), jnp.float32)
            p["bm"] = 0.1 * jax.random.normal(
                k6, (out_channels,), jnp.float32)
        params.append(p)
        in_channels = out_channels
    return params


if __name__ == "__main__":
    key = jax.random.PRNGKey(0)
    kx1, kp1, kx2, kp2 = jax.random.split(key, 4)

    # Test 1: identity-skip path (in == out channels), 2 layers.
    N, C, C_RES, H, W, LAYERS = 2, 8, 4, 16, 16, 2
    x1 = jax.random.normal(kx1, (N, C, H, W), jnp.float32)        # NCHW input
    params1 = make_params(kp1, C, C_RES, C, LAYERS)
    out1 = jax.block_until_ready(residual_stack_forward(x1, params1))
    ref1 = jax.block_until_ready(residual_stack_reference(x1, params1))
    assert out1.shape == (N, C, H, W)
    assert jnp.allclose(out1, ref1, atol=1e-4, rtol=1e-4)

    # Test 2: 1x1 channel_match path (in != out channels), single layer.
    x2 = jax.random.normal(kx2, (N, 8, H, W), jnp.float32)
    params2 = make_params(kp2, 8, 4, 16, 1)
    out2 = jax.block_until_ready(residual_stack_forward(x2, params2))
    ref2 = jax.block_until_ready(residual_stack_reference(x2, params2))
    assert out2.shape == (N, 16, H, W)
    assert jnp.allclose(out2, ref2, atol=1e-4, rtol=1e-4)

    print("KERNEL_OK")
</pallas_src>

<mosaic_0001>
module attributes {stable_mosaic.version = 11 : i64} {
  func.func @_res_stack_kernel(%arg0: i32, %arg1: memref<1x16x128xf32, #tpu.memory_space<vmem>>, %arg2: memref<3x128x64xf32, #tpu.memory_space<vmem>>, %arg3: memref<1x64xf32, #tpu.memory_space<vmem>>, %arg4: memref<3x64x128xf32, #tpu.memory_space<vmem>>, %arg5: memref<1x128xf32, #tpu.memory_space<vmem>>, %arg6: memref<3x128x64xf32, #tpu.memory_space<vmem>>, %arg7: memref<1x64xf32, #tpu.memory_space<vmem>>, %arg8: memref<3x64x128xf32, #tpu.memory_space<vmem>>, %arg9: memref<1x128xf32, #tpu.memory_space<vmem>>, %arg10: memref<1x16x128xf32, #tpu.memory_space<vmem>>) attributes {dimension_semantics = [#tpu.dimension_semantics<parallel>], iteration_bounds = array<i64: 2>, scalar_prefetch = 0 : i64, scratch_operands = 0 : i64, tpu.core_type = #tpu.core_type<tc>, window_params = [{transform_indices = @transform_0, window_bounds = array<i64: 1, 16, 128>}, {pipeline_mode = #tpu.pipeline_mode<synchronous>, transform_indices = @transform_1, window_bounds = array<i64: 3, 128, 64>}, {pipeline_mode = #tpu.pipeline_mode<synchronous>, transform_indices = @transform_2, window_bounds = array<i64: 1, 64>}, {pipeline_mode = #tpu.pipeline_mode<synchronous>, transform_indices = @transform_3, window_bounds = array<i64: 3, 64, 128>}, {pipeline_mode = #tpu.pipeline_mode<synchronous>, transform_indices = @transform_4, window_bounds = array<i64: 1, 128>}, {pipeline_mode = #tpu.pipeline_mode<synchronous>, transform_indices = @transform_5, window_bounds = array<i64: 3, 128, 64>}, {pipeline_mode = #tpu.pipeline_mode<synchronous>, transform_indices = @transform_6, window_bounds = array<i64: 1, 64>}, {pipeline_mode = #tpu.pipeline_mode<synchronous>, transform_indices = @transform_7, window_bounds = array<i64: 3, 64, 128>}, {pipeline_mode = #tpu.pipeline_mode<synchronous>, transform_indices = @transform_8, window_bounds = array<i64: 1, 128>}, {transform_indices = @transform_9, window_bounds = array<i64: 1, 16, 128>}]} {
    %c0 = arith.constant 0 : index
    %c0_0 = arith.constant 0 : index
    %c0_1 = arith.constant 0 : index
    %0 = vector.load %arg1[%c0, %c0_0, %c0_1] : memref<1x16x128xf32, #tpu.memory_space<vmem>>, vector<1x16x128xf32>
    %1 = vector.shape_cast %0 : vector<1x16x128xf32> to vector<16x128xf32>
    %cst = arith.constant 0.000000e+00 : f32
    %2 = vector.broadcast %cst : f32 to vector<16x128xf32>
    %3 = arith.maximumf %1, %2 : vector<16x128xf32>
    %cst_2 = arith.constant 0.000000e+00 : f32
    %4 = vector.broadcast %cst_2 : f32 to vector<1x128xf32>
    %5 = tpu.concatenate %4, %3, %4 in 0 : vector<1x128xf32>, vector<16x128xf32>, vector<1x128xf32> -> vector<18x128xf32>
    %6 = vector.extract_strided_slice %5 {offsets = [0, 0], sizes = [16, 128], strides = [1, 1]} : vector<18x128xf32> to vector<16x128xf32>
    %c0_3 = arith.constant 0 : index
    %c0_4 = arith.constant 0 : index
    %c0_5 = arith.constant 0 : index
    %7 = vector.load %arg2[%c0_3, %c0_4, %c0_5] : memref<3x128x64xf32, #tpu.memory_space<vmem>>, vector<1x128x64xf32>
    %8 = vector.shape_cast %7 : vector<1x128x64xf32> to vector<128x64xf32>
    %cst_6 = arith.constant dense<0.000000e+00> : vector<16x64xf32>
    %9 = tpu.matmul %6, %8, %cst_6 {dimension_numbers = #tpu.dot_dimension_numbers<[1], [0], [0], [1], [0, 0, 1, 1], [], []>} : vector<16x128xf32>, vector<128x64xf32>, vector<16x64xf32> -> vector<16x64xf32>
    %10 = vector.extract_strided_slice %5 {offsets = [1, 0], sizes = [16, 128], strides = [1, 1]} : vector<18x128xf32> to vector<16x128xf32>
    %c1 = arith.constant 1 : index
    %c0_7 = arith.constant 0 : index
    %c0_8 = arith.constant 0 : index
    %11 = vector.load %arg2[%c1, %c0_7, %c0_8] : memref<3x128x64xf32, #tpu.memory_space<vmem>>, vector<1x128x64xf32>
    %12 = vector.shape_cast %11 : vector<1x128x64xf32> to vector<128x64xf32>
    %cst_9 = arith.constant dense<0.000000e+00> : vector<16x64xf32>
    %13 = tpu.matmul %10, %12, %cst_9 {dimension_numbers = #tpu.dot_dimension_numbers<[1], [0], [0], [1], [0, 0, 1, 1], [], []>} : vector<16x128xf32>, vector<128x64xf32>, vector<16x64xf32> -> vector<16x64xf32>
    %14 = arith.addf %9, %13 : vector<16x64xf32>
    %15 = vector.extract_strided_slice %5 {offsets = [2, 0], sizes = [16, 128], strides = [1, 1]} : vector<18x128xf32> to vector<16x128xf32>
    %c2 = arith.constant 2 : index
    %c0_10 = arith.constant 0 : index
    %c0_11 = arith.constant 0 : index
    %16 = vector.load %arg2[%c2, %c0_10, %c0_11] : memref<3x128x64xf32, #tpu.memory_space<vmem>>, vector<1x128x64xf32>
    %17 = vector.shape_cast %16 : vector<1x128x64xf32> to vector<128x64xf32>
    %cst_12 = arith.constant dense<0.000000e+00> : vector<16x64xf32>
    %18 = tpu.matmul %15, %17, %cst_12 {dimension_numbers = #tpu.dot_dimension_numbers<[1], [0], [0], [1], [0, 0, 1, 1], [], []>} : vector<16x128xf32>, vector<128x64xf32>, vector<16x64xf32> -> vector<16x64xf32>
    %19 = arith.addf %14, %18 : vector<16x64xf32>
    %c0_13 = arith.constant 0 : index
    %c0_14 = arith.constant 0 : index
    %20 = vector.load %arg3[%c0_13, %c0_14] : memref<1x64xf32, #tpu.memory_space<vmem>>, vector<1x64xf32>
    %21 = vector.broadcast %20 : vector<1x64xf32> to vector<16x64xf32>
    %22 = arith.addf %19, %21 : vector<16x64xf32>
    %cst_15 = arith.constant 0.000000e+00 : f32
    %23 = vector.broadcast %cst_15 : f32 to vector<16x64xf32>
    %24 = arith.maximumf %22, %23 : vector<16x64xf32>
    %cst_16 = arith.constant 0.000000e+00 : f32
    %25 = vector.broadcast %cst_16 : f32 to vector<1x64xf32>
    %26 = tpu.concatenate %25, %24, %25 in 0 : vector<1x64xf32>, vector<16x64xf32>, vector<1x64xf32> -> vector<18x64xf32>
    %27 = vector.extract_strided_slice %26 {offsets = [0, 0], sizes = [16, 64], strides = [1, 1]} : vector<18x64xf32> to vector<16x64xf32>
    %c0_17 = arith.constant 0 : index
    %c0_18 = arith.constant 0 : index
    %c0_19 = arith.constant 0 : index
    %28 = vector.load %arg4[%c0_17, %c0_18, %c0_19] : memref<3x64x128xf32, #tpu.memory_space<vmem>>, vector<1x64x128xf32>
    %29 = vector.shape_cast %28 : vector<1x64x128xf32> to vector<64x128xf32>
    %cst_20 = arith.constant dense<0.000000e+00> : vector<16x128xf32>
    %30 = tpu.matmul %27, %29, %cst_20 {dimension_numbers = #tpu.dot_dimension_numbers<[1], [0], [0], [1], [0, 0, 1, 1], [], []>} : vector<16x64xf32>, vector<64x128xf32>, vector<16x128xf32> -> vector<16x128xf32>
    %31 = vector.extract_strided_slice %26 {offsets = [1, 0], sizes = [16, 64], strides = [1, 1]} : vector<18x64xf32> to vector<16x64xf32>
    %c1_21 = arith.constant 1 : index
    %c0_22 = arith.constant 0 : index
    %c0_23 = arith.constant 0 : index
    %32 = vector.load %arg4[%c1_21, %c0_22, %c0_23] : memref<3x64x128xf32, #tpu.memory_space<vmem>>, vector<1x64x128xf32>
    %33 = vector.shape_cast %32 : vector<1x64x128xf32> to vector<64x128xf32>
    %cst_24 = arith.constant dense<0.000000e+00> : vector<16x128xf32>
    %34 = tpu.matmul %31, %33, %cst_24 {dimension_numbers = #tpu.dot_dimension_numbers<[1], [0], [0], [1], [0, 0, 1, 1], [], []>} : vector<16x64xf32>, vector<64x128xf32>, vector<16x128xf32> -> vector<16x128xf32>
    %35 = arith.addf %30, %34 : vector<16x128xf32>
    %36 = vector.extract_strided_slice %26 {offsets = [2, 0], sizes = [16, 64], strides = [1, 1]} : vector<18x64xf32> to vector<16x64xf32>
    %c2_25 = arith.constant 2 : index
    %c0_26 = arith.constant 0 : index
    %c0_27 = arith.constant 0 : index
    %37 = vector.load %arg4[%c2_25, %c0_26, %c0_27] : memref<3x64x128xf32, #tpu.memory_space<vmem>>, vector<1x64x128xf32>
    %38 = vector.shape_cast %37 : vector<1x64x128xf32> to vector<64x128xf32>
    %cst_28 = arith.constant dense<0.000000e+00> : vector<16x128xf32>
    %39 = tpu.matmul %36, %38, %cst_28 {dimension_numbers = #tpu.dot_dimension_numbers<[1], [0], [0], [1], [0, 0, 1, 1], [], []>} : vector<16x64xf32>, vector<64x128xf32>, vector<16x128xf32> -> vector<16x128xf32>
    %40 = arith.addf %35, %39 : vector<16x128xf32>
    %c0_29 = arith.constant 0 : index
    %c0_30 = arith.constant 0 : index
    %41 = vector.load %arg5[%c0_29, %c0_30] : memref<1x128xf32, #tpu.memory_space<vmem>>, vector<1x128xf32>
    %42 = vector.broadcast %41 : vector<1x128xf32> to vector<16x128xf32>
    %43 = arith.addf %40, %42 : vector<16x128xf32>
    %44 = arith.addf %43, %1 : vector<16x128xf32>
    %cst_31 = arith.constant 0.000000e+00 : f32
    %45 = vector.broadcast %cst_31 : f32 to vector<16x128xf32>
    %46 = arith.maximumf %44, %45 : vector<16x128xf32>
    %cst_32 = arith.constant 0.000000e+00 : f32
    %47 = vector.broadcast %cst_32 : f32 to vector<1x128xf32>
    %48 = tpu.concatenate %47, %46, %47 in 0 : vector<1x128xf32>, vector<16x128xf32>, vector<1x128xf32> -> vector<18x128xf32>
    %49 = vector.extract_strided_slice %48 {offsets = [0, 0], sizes = [16, 128], strides = [1, 1]} : vector<18x128xf32> to vector<16x128xf32>
    %c0_33 = arith.constant 0 : index
    %c0_34 = arith.constant 0 : index
    %c0_35 = arith.constant 0 : index
    %50 = vector.load %arg6[%c0_33, %c0_34, %c0_35] : memref<3x128x64xf32, #tpu.memory_space<vmem>>, vector<1x128x64xf32>
    %51 = vector.shape_cast %50 : vector<1x128x64xf32> to vector<128x64xf32>
    %cst_36 = arith.constant dense<0.000000e+00> : vector<16x64xf32>
    %52 = tpu.matmul %49, %51, %cst_36 {dimension_numbers = #tpu.dot_dimension_numbers<[1], [0], [0], [1], [0, 0, 1, 1], [], []>} : vector<16x128xf32>, vector<128x64xf32>, vector<16x64xf32> -> vector<16x64xf32>
    %53 = vector.extract_strided_slice %48 {offsets = [1, 0], sizes = [16, 128], strides = [1, 1]} : vector<18x128xf32> to vector<16x128xf32>
    %c1_37 = arith.constant 1 : index
    %c0_38 = arith.constant 0 : index
    %c0_39 = arith.constant 0 : index
    %54 = vector.load %arg6[%c1_37, %c0_38, %c0_39] : memref<3x128x64xf32, #tpu.memory_space<vmem>>, vector<1x128x64xf32>
    %55 = vector.shape_cast %54 : vector<1x128x64xf32> to vector<128x64xf32>
    %cst_40 = arith.constant dense<0.000000e+00> : vector<16x64xf32>
    %56 = tpu.matmul %53, %55, %cst_40 {dimension_numbers = #tpu.dot_dimension_numbers<[1], [0], [0], [1], [0, 0, 1, 1], [], []>} : vector<16x128xf32>, vector<128x64xf32>, vector<16x64xf32> -> vector<16x64xf32>
    %57 = arith.addf %52, %56 : vector<16x64xf32>
    %58 = vector.extract_strided_slice %48 {offsets = [2, 0], sizes = [16, 128], strides = [1, 1]} : vector<18x128xf32> to vector<16x128xf32>
    %c2_41 = arith.constant 2 : index
    %c0_42 = arith.constant 0 : index
    %c0_43 = arith.constant 0 : index
    %59 = vector.load %arg6[%c2_41, %c0_42, %c0_43] : memref<3x128x64xf32, #tpu.memory_space<vmem>>, vector<1x128x64xf32>
    %60 = vector.shape_cast %59 : vector<1x128x64xf32> to vector<128x64xf32>
    %cst_44 = arith.constant dense<0.000000e+00> : vector<16x64xf32>
    %61 = tpu.matmul %58, %60, %cst_44 {dimension_numbers = #tpu.dot_dimension_numbers<[1], [0], [0], [1], [0, 0, 1, 1], [], []>} : vector<16x128xf32>, vector<128x64xf32>, vector<16x64xf32> -> vector<16x64xf32>
    %62 = arith.addf %57, %61 : vector<16x64xf32>
    %c0_45 = arith.constant 0 : index
    %c0_46 = arith.constant 0 : index
    %63 = vector.load %arg7[%c0_45, %c0_46] : memref<1x64xf32, #tpu.memory_space<vmem>>, vector<1x64xf32>
    %64 = vector.broadcast %63 : vector<1x64xf32> to vector<16x64xf32>
    %65 = arith.addf %62, %64 : vector<16x64xf32>
    %cst_47 = arith.constant 0.000000e+00 : f32
    %66 = vector.broadcast %cst_47 : f32 to vector<16x64xf32>
    %67 = arith.maximumf %65, %66 : vector<16x64xf32>
    %cst_48 = arith.constant 0.000000e+00 : f32
    %68 = vector.broadcast %cst_48 : f32 to vector<1x64xf32>
    %69 = tpu.concatenate %68, %67, %68 in 0 : vector<1x64xf32>, vector<16x64xf32>, vector<1x64xf32> -> vector<18x64xf32>
    %70 = vector.extract_strided_slice %69 {offsets = [0, 0], sizes = [16, 64], strides = [1, 1]} : vector<18x64xf32> to vector<16x64xf32>
    %c0_49 = arith.constant 0 : index
    %c0_50 = arith.constant 0 : index
    %c0_51 = arith.constant 0 : index
    %71 = vector.load %arg8[%c0_49, %c0_50, %c0_51] : memref<3x64x128xf32, #tpu.memory_space<vmem>>, vector<1x64x128xf32>
    %72 = vector.shape_cast %71 : vector<1x64x128xf32> to vector<64x128xf32>
    %cst_52 = arith.constant dense<0.000000e+00> : vector<16x128xf32>
    %73 = tpu.matmul %70, %72, %cst_52 {dimension_numbers = #tpu.dot_dimension_numbers<[1], [0], [0], [1], [0, 0, 1, 1], [], []>} : vector<16x64xf32>, vector<64x128xf32>, vector<16x128xf32> -> vector<16x128xf32>
    %74 = vector.extract_strided_slice %69 {offsets = [1, 0], sizes = [16, 64], strides = [1, 1]} : vector<18x64xf32> to vector<16x64xf32>
    %c1_53 = arith.constant 1 : index
    %c0_54 = arith.constant 0 : index
    %c0_55 = arith.constant 0 : index
    %75 = vector.load %arg8[%c1_53, %c0_54, %c0_55] : memref<3x64x128xf32, #tpu.memory_space<vmem>>, vector<1x64x128xf32>
    %76 = vector.shape_cast %75 : vector<1x64x128xf32> to vector<64x128xf32>
    %cst_56 = arith.constant dense<0.000000e+00> : vector<16x128xf32>
    %77 = tpu.matmul %74, %76, %cst_56 {dimension_numbers = #tpu.dot_dimension_numbers<[1], [0], [0], [1], [0, 0, 1, 1], [], []>} : vector<16x64xf32>, vector<64x128xf32>, vector<16x128xf32> -> vector<16x128xf32>
    %78 = arith.addf %73, %77 : vector<16x128xf32>
    %79 = vector.extract_strided_slice %69 {offsets = [2, 0], sizes = [16, 64], strides = [1, 1]} : vector<18x64xf32> to vector<16x64xf32>
    %c2_57 = arith.constant 2 : index
    %c0_58 = arith.constant 0 : index
    %c0_59 = arith.constant 0 : index
    %80 = vector.load %arg8[%c2_57, %c0_58, %c0_59] : memref<3x64x128xf32, #tpu.memory_space<vmem>>, vector<1x64x128xf32>
    %81 = vector.shape_cast %80 : vector<1x64x128xf32> to vector<64x128xf32>
    %cst_60 = arith.constant dense<0.000000e+00> : vector<16x128xf32>
    %82 = tpu.matmul %79, %81, %cst_60 {dimension_numbers = #tpu.dot_dimension_numbers<[1], [0], [0], [1], [0, 0, 1, 1], [], []>} : vector<16x64xf32>, vector<64x128xf32>, vector<16x128xf32> -> vector<16x128xf32>
    %83 = arith.addf %78, %82 : vector<16x128xf32>
    %c0_61 = arith.constant 0 : index
    %c0_62 = arith.constant 0 : index
    %84 = vector.load %arg9[%c0_61, %c0_62] : memref<1x128xf32, #tpu.memory_space<vmem>>, vector<1x128xf32>
    %85 = vector.broadcast %84 : vector<1x128xf32> to vector<16x128xf32>
    %86 = arith.addf %83, %85 : vector<16x128xf32>
    %87 = arith.addf %86, %44 : vector<16x128xf32>
    %cst_63 = arith.constant 0.000000e+00 : f32
    %88 = vector.broadcast %cst_63 : f32 to vector<16x128xf32>
    %89 = arith.maximumf %87, %88 : vector<16x128xf32>
    %c0_64 = arith.constant 0 : index
    %c0_65 = arith.constant 0 : index
    %c0_66 = arith.constant 0 : index
    %90 = vector.load %arg10[%c0_64, %c0_65, %c0_66] : memref<1x16x128xf32, #tpu.memory_space<vmem>>, vector<1x16x128xf32>
    %91 = vector.shape_cast %90 : vector<1x16x128xf32> to vector<16x128xf32>
    %92 = vector.shape_cast %89 : vector<16x128xf32> to vector<1x16x128xf32>
    tpu.vector_store %arg10[%c0_64, %c0_65, %c0_66], %92 {strides = array<i32>} : memref<1x16x128xf32, #tpu.memory_space<vmem>>, vector<1x16x128xf32>,
    return
  }
  func.func @transform_0(%arg0: i32) -> (i32, i32, i32) {
    %c0_i32 = arith.constant 0 : i32
    %c0_i32_0 = arith.constant 0 : i32
    %c0_i32_1 = arith.constant 0 : i32
    return %arg0, %c0_i32, %c0_i32_0 : i32, i32, i32
  }
  func.func @transform_1(%arg0: i32) -> (i32, i32, i32) {
    %c0_i32 = arith.constant 0 : i32
    %c0_i32_0 = arith.constant 0 : i32
    %c0_i32_1 = arith.constant 0 : i32
    %c0_i32_2 = arith.constant 0 : i32
    return %c0_i32, %c0_i32_0, %c0_i32_1 : i32, i32, i32
  }
  func.func @transform_2(%arg0: i32) -> (i32, i32) {
    %c0_i32 = arith.constant 0 : i32
    %c0_i32_0 = arith.constant 0 : i32
    %c0_i32_1 = arith.constant 0 : i32
    return %c0_i32, %c0_i32_0 : i32, i32
  }
  func.func @transform_3(%arg0: i32) -> (i32, i32, i32) {
    %c0_i32 = arith.constant 0 : i32
    %c0_i32_0 = arith.constant 0 : i32
    %c0_i32_1 = arith.constant 0 : i32
    %c0_i32_2 = arith.constant 0 : i32
    return %c0_i32, %c0_i32_0, %c0_i32_1 : i32, i32, i32
  }
  func.func @transform_4(%arg0: i32) -> (i32, i32) {
    %c0_i32 = arith.constant 0 : i32
    %c0_i32_0 = arith.constant 0 : i32
    %c0_i32_1 = arith.constant 0 : i32
    return %c0_i32, %c0_i32_0 : i32, i32
  }
  func.func @transform_5(%arg0: i32) -> (i32, i32, i32) {
    %c0_i32 = arith.constant 0 : i32
    %c0_i32_0 = arith.constant 0 : i32
    %c0_i32_1 = arith.constant 0 : i32
    %c0_i32_2 = arith.constant 0 : i32
    return %c0_i32, %c0_i32_0, %c0_i32_1 : i32, i32, i32
  }
  func.func @transform_6(%arg0: i32) -> (i32, i32) {
    %c0_i32 = arith.constant 0 : i32
    %c0_i32_0 = arith.constant 0 : i32
    %c0_i32_1 = arith.constant 0 : i32
    return %c0_i32, %c0_i32_0 : i32, i32
  }
  func.func @transform_7(%arg0: i32) -> (i32, i32, i32) {
    %c0_i32 = arith.constant 0 : i32
    %c0_i32_0 = arith.constant 0 : i32
    %c0_i32_1 = arith.constant 0 : i32
    %c0_i32_2 = arith.constant 0 : i32
    return %c0_i32, %c0_i32_0, %c0_i32_1 : i32, i32, i32
  }
  func.func @transform_8(%arg0: i32) -> (i32, i32) {
    %c0_i32 = arith.constant 0 : i32
    %c0_i32_0 = arith.constant 0 : i32
    %c0_i32_1 = arith.constant 0 : i32
    return %c0_i32, %c0_i32_0 : i32, i32
  }
  func.func @transform_9(%arg0: i32) -> (i32, i32, i32) {
    %c0_i32 = arith.constant 0 : i32
    %c0_i32_0 = arith.constant 0 : i32
    %c0_i32_1 = arith.constant 0 : i32
    return %arg0, %c0_i32, %c0_i32_0 : i32, i32, i32
  }
}

</mosaic_0001>

<bundles_post_ra>
// kernel: tpu_custom_call.1
= control target key start
LH: loop header
LB: loop body
LE: loop exit
PB: predicated region body
PF: predicated region fallthrough
CT: control target
= control target key end

     0   :  { %14 = vsyncpa [#allocation3], 0  ;;  %s3054_s0 = inlined_call_operand.vmem [shape: f32[2,16,128], index: 0, kind: input, shape index: {}]   ;;  %s3055_s1 = inlined_call_operand.vmem [shape: f32[3,128,64], index: 1, kind: input, shape index: {}]   ;;  %s3056_s2 = inlined_call_operand.vmem [shape: f32[1,64], index: 2, kind: input, shape index: {}]   ;;  %s3057_s3 = inlined_call_operand.vmem [shape: f32[3,64,128], index: 3, kind: input, shape index: {}]   ;;  %s3058_s4 = inlined_call_operand.vmem [shape: f32[1,128], index: 4, kind: input, shape index: {}]   ;;  %s3059_s5 = inlined_call_operand.vmem [shape: f32[3,128,64], index: 5, kind: input, shape index: {}]   ;;  %s3060_s6 = inlined_call_operand.vmem [shape: f32[1,64], index: 6, kind: input, shape index: {}]   ;;  %s3061_s7 = inlined_call_operand.vmem [shape: f32[3,64,128], index: 7, kind: input, shape index: {}]   ;;  %s3062_s8 = inlined_call_operand.vmem [shape: f32[1,128], index: 8, kind: input, shape index: {}]   ;;  %s3063_s9 = inlined_call_operand.hbm [shape: f32[2,16,128], index: 9, kind: output, shape index: {}]  }
   0x1   :  { %16 = vsyncpa [#allocation3 + $0x1], 0  ;;  %s2421_s30 = smov 0   ;;  %s2423_s10 = smov 0  }
   0x2   :  { %s2425_s11 = smov 0   ;;  %s2427_s12 = smov 0  }
   0x3 LB: > { %s2442_s13 = sadd.s32 4294967295, %s2366_s12   ;;  %s1643_s14 = sadd.s32 4294967294, %s2366_s12   ;;  %s2366_s12 = sphi %s2427_s12, %s3071_s12   ;;  %s2362_s11 = sphi %s2425_s11, %s3070_s11   ;;  %s2358_s10 = sphi %s2423_s10, %s3069_s10   ;;  %s2354_s30 = sphi %s2421_s30, %s3068_s30  }
   0x4   : > { %s2446_s15 = sadd.s32 1, %s2366_s12   ;;  %s223_s16 = sadd.s32 1, %s2362_s11 }
   0x5   : > { %s220_s17 = ssub.s32 %s2366_s12, %s2446_s15  ;;  %p233_p0 = scmp.ne.s32.totalorder %s2362_s11, %s2358_s10 }
   0x6   : > { %p221_p1 = scmp.eq.s32.totalorder %s220_s17, 0  ;;  %p234_p2 = scmp.eq.s32.totalorder %s2442_s13, 1 }
   0x7   : > { %p239_p3 = scmp.ne.s32.totalorder %s2358_s10, %s2354_s30  ;;  %p240_p4 = scmp.eq.s32.totalorder %s1643_s14, 1 }
   0x8   : > { %s2457_s18 = scalar_select %p221_p1, %s2362_s11, %s223_s16  }
   0x9   : > { %p2459_p5 = por %p234_p2, %p233_p0  ;;  %p2463_p6 = por %p240_p4, %p239_p3 }
   0xa   : > { %p1646_p7 = scmp.ge.s32.totalorder %s2366_s12, 1  ;;  %p290_p8 = scmp.lt.s32.totalorder %s2366_s12, 3 }
   0xc   : > { %p291_p9 = pnand %p1646_p7, %p290_p8 }
   0xd   : > { %p326_p10 = scmp.lt.s32.totalorder (!%p291_p9), %s2442_s13, 1  ;;  %s323_s17 = sand.u32 (!%p291_p9), 1, %s2358_s10  }
   0xe   : > { %294 = sbr.rel (%p291_p9) target bundleno = 997 (0x3e5), region = 56  ;;  %s1647_s22 = sshll.u32 (!%p291_p9), %s323_s17, 4 }
   0xf   : > { %s1772_s24 = sshll.u32 (!%p291_p9), %s2442_s13, 8  ;;  %s2368_s16 = smov (!%p291_p9), [#allocation2]  }
  0x10   : > { %s3010_s14 = scalar_lea.hbm (!%p291_p9), %s3063_s9, %s1772_s24 }
  0x13   : > { %v1665_v0 = vld [vmem:[%s3055_s1 + $0xf8] sm:$0xff]  ;;  %v1664_v2 = vld [vmem:[%s3055_s1 + $0xf0] sm:$0xff]  ;;  %v1663_v4 = vld [vmem:[%s3055_s1 + $0xe8] sm:$0xff]  ;;  %s327_s21 = scalar_select %p326_p10, %s2442_s13, 1  ;;  %vm337_vm0 = vcmask 1040384   ;;  %vm381_vm1 = vcmask 1046528  }
  0x14   : > { %v361_v1 = vld [vmem:[%s3055_s1 + $0x78] sm:$0xff]  ;;  %1941 = vmatprep.subr.mxu0 %v1665_v0  ;;  %v360_v3 = vld [vmem:[%s3055_s1 + $0x70] sm:$0xff]  ;;  %v359_v5 = vld [vmem:[%s3055_s1 + $0x68] sm:$0xff]  ;;  %vm556_vm2 = vcmask 1045504   ;;  %vm685_vm4 = vcmask 523264  }
  0x15   : > { %1976 = vmatprep.subr.mxu1 %v361_v1  ;;  %1942 = vmatpush3.msra.mxu0 %v1665_v0  ;;  %v1662_v6 = vld [vmem:[%s3055_s1 + $0xe0] sm:$0xff]  ;;  %s1771_s26 = sshll.u32 %s327_s21, 4  ;;  %v1661_v8 = vld [vmem:[%s3055_s1 + $0xd8] sm:$0xff]  ;;  %v1660_v10 = vld [vmem:[%s3055_s1 + $0xd0] sm:$0xff] }
  0x16   : > { %1977 = vmatpush3.msra.mxu1 %v361_v1  ;;  %1943 = vmatprep.subr.mxu0 %v1664_v2  ;;  %v358_v7 = vld [vmem:[%s3055_s1 + $0x60] sm:$0xff]  ;;  %v357_v9 = vld [vmem:[%s3055_s1 + $0x58] sm:$0xff]  ;;  %v356_v11 = vld [vmem:[%s3055_s1 + $0x50] sm:$0xff]  ;;  %s330_s25 = scalar_lea.vmem %s3054_s0, %s1771_s26  ;;  %s3014_s26 = scalar_lea.sflag [#allocation3], %s323_s17 }
  0x17   : > { %1978 = vmatprep.subr.mxu1 %v360_v3  ;;  %1944 = vmatpush3.msra.mxu0 %v1664_v2  ;;  %v1659_v12 = vld [vmem:[%s3055_s1 + $0xc8] sm:$0xff]  ;;  %v2516_v14 = vld [vmem:[%s330_s25] sm:$0xff]  ;;  %v1657_v18 = vld [vmem:[%s3055_s1 + $0xb8] sm:$0xff] }
  0x18   : > { %1979 = vmatpush3.msra.mxu1 %v360_v3  ;;  %1945 = vmatprep.subr.mxu0 %v1663_v4  ;;  %v355_v13 = vld [vmem:[%s3055_s1 + $0x48] sm:$0xff]  ;;  %v1658_v16 = vld [vmem:[%s3055_s1 + $0xc0] sm:$0xff]  ;;  %v353_v19 = vld [vmem:[%s3055_s1 + $0x38] sm:$0xff]  ;;  %v333_v20 = vmax.f32 %v2516_v14, 0.0 }
  0x19   : > { %1980 = vmatprep.subr.mxu1 %v359_v5  ;;  %1946 = vmatpush3.msra.mxu0 %v1663_v4  ;;  %v2518_v15 = vld [vmem:[%s330_s25 + $0x8] sm:$0xff]  ;;  %v354_v17 = vld [vmem:[%s3055_s1 + $0x40] sm:$0xff]  ;;  %v1656_v22 = vld [vmem:[%s3055_s1 + $0xb0] sm:$0xff]  ;;  %s325_s25 = scalar_lea.vmem [#allocation2], %s1647_s22  ;;  %s2310_s22 = sshll.u32 %s2368_s16, 4  ;;  %s2311_s22 = int_to_ptr.vmem [resolvable:$false] %s2310_s22 }
  0x1a   : > { %1981 = vmatpush3.msra.mxu1 %v359_v5  ;;  %1947 = vmatprep.subr.mxu0 %v1662_v6  ;;  %v334_v21 = vmax.f32 %v2518_v15, 0.0  ;;  %v352_v23 = vld [vmem:[%s3055_s1 + $0x30] sm:$0xff]  ;;  %v1655_v24 = vld [vmem:[%s3055_s1 + $0xa8] sm:$0xff]  ;;  %v338_v26 = vrot.slane %v333_v20, 7  ;;  %v1654_v28 = vld [vmem:[%s3055_s1 + $0xa0] sm:$0xff]  ;;  %s1581_s27 = sshll.u32 %s325_s25, 4  ;;  %s3012_s27 = int_to_ptr.vmem [resolvable:$true] %s1581_s27 }
  0x1b   : > { %1982 = vmatprep.subr.mxu1 %v358_v7  ;;  %1948 = vmatpush3.msra.mxu0 %v1662_v6  ;;  %v351_v25 = vld [vmem:[%s3055_s1 + $0x28] sm:$0xff]  ;;  %v350_v29 = vld [vmem:[%s3055_s1 + $0x20] sm:$0xff]  ;;  %v1653_v30 = vld [vmem:[%s3055_s1 + $0x98] sm:$0xff]  ;;  %s2306_s13 = scalar_lea.vmem %s3012_s27, 256  ;;  %s2312_s21 = scalar_lea.vmem %s2311_s22, 512 }
  0x1c   : > { %1983 = vmatpush3.msra.mxu1 %v358_v7  ;;  %1949 = vmatprep.subr.mxu0 %v1661_v8  ;;  %v339_v27 = vrot.slane %v334_v21, 7  ;;  %v349_v31 = vld [vmem:[%s3055_s1 + $0x18] sm:$0xff]  ;;  %v344_v33 = vsel %vm337_vm0, 0.0, %v338_v26  ;;  %v1652_v34 = vld [vmem:[%s3055_s1 + $0x90] sm:$0xff]  ;;  %v1651_v39 = vld [vmem:[%s3055_s1 + $0x88] sm:$0xff]  ;;  %p2307_p11 = scmp.ne.s32.totalorder %s3012_s27, %s2306_s13  ;;  %p2313_p0 = scmp.lt.s32.totalorder %s3012_s27, %s2311_s22 }
  0x1d   : > { %1984 = vmatprep.subr.mxu1 %v357_v9  ;;  %1950 = vmatpush3.msra.mxu0 %v1661_v8  ;;  %v348_v35 = vld [vmem:[%s3055_s1 + $0x10] sm:$0xff]  ;;  %v382_v37 = vrot.slane %v344_v33, 1  ;;  %v347_v40 = vld [vmem:[%s3055_s1 + $0x8] sm:$0xff]  ;;  %v1650_v42 = vld [vmem:[%s3055_s1 + $0x80] sm:$0xff]  ;;  %v557_v44 = vrot.slane %v344_v33, 2  ;;  %p2314_p1 = scmp.lt.s32.totalorder %s2312_s21, %s2306_s13 }
  0x1e   : > { %1985 = vmatpush3.msra.mxu1 %v357_v9  ;;  %1951 = vmatprep.subr.mxu0 %v1660_v10  ;;  %v2559_v32 = vsel %vm337_vm0, %v338_v26, %v339_v27  ;;  %v2569_v36 = vsel %vm337_vm0, %v339_v27, 0.0  ;;  %v346_v43 = vld [vmem:[%s3055_s1] sm:$0xff]  ;;  %vm2588_vm3 = vmneg %vm337_vm0  ;;  %v1683_v49 = vld [vmem:[%s3055_s1 + $0x178] sm:$0xff]  ;;  %p2308_p12 = pnand %p2307_p11, %p2459_p5 }
  0x1f   : > { %1986 = vmatprep.subr.mxu1 %v356_v11  ;;  %1952 = vmatpush3.msra.mxu0 %v1660_v10  ;;  %v383_v38 = vrot.slane %v2559_v32, 1  ;;  %v385_v41 = vrot.slane %v2569_v36, 1  ;;  %v558_v45 = vrot.slane %v2559_v32, 2  ;;  %v1682_v51 = vld [vmem:[%s3055_s1 + $0x170] sm:$0xff]  ;;  %v1681_v52 = vld [vmem:[%s3055_s1 + $0x168] sm:$0xff]  ;;  %v1680_v53 = vld [vmem:[%s3055_s1 + $0x160] sm:$0xff]  ;;  %p2315_p2 = por %p2314_p1, %p2313_p0 }
  0x20   : > { %1987 = vmatpush3.msra.mxu1 %v356_v11  ;;  %1953 = vmatprep.subr.mxu0 %v1659_v12  ;;  %v1679_v54 = vld [vmem:[%s3055_s1 + $0x158] sm:$0xff]  ;;  %v1678_v55 = vld [vmem:[%s3055_s1 + $0x150] sm:$0xff]  ;;  %v1677_v56 = vld [vmem:[%s3055_s1 + $0x148] sm:$0xff]  ;;  %v560_v1 = vrot.slane %v2569_v36, 2  ;;  %p2309_p13 = pneg %p2308_p12 }
  0x21   : > { %1988 = vmatprep.subr.mxu1 %v355_v13  ;;  %1954 = vmatpush3.msra.mxu0 %v1659_v12  ;;  %v384_v46 = vsel %vm381_vm1, %v382_v37, %v383_v38  ;;  %v386_v48 = vsel %vm381_vm1, %v383_v38, %v385_v41  ;;  %v559_v50 = vsel %vm556_vm2, %v557_v44, %v558_v45  ;;  %v1676_v57 = vld [vmem:[%s3055_s1 + $0x140] sm:$0xff]  ;;  %v1675_v58 = vld [vmem:[%s3055_s1 + $0x138] sm:$0xff]  ;;  %v1674_v59 = vld [vmem:[%s3055_s1 + $0x130] sm:$0xff] }
  0x22   : > { %1989 = vmatpush3.msra.mxu1 %v355_v13  ;;  %1955 = vmatprep.subr.mxu0 %v1658_v16  ;;  %v1673_v60 = vld [vmem:[%s3055_s1 + $0x128] sm:$0xff]  ;;  %v1672_v61 = vld [vmem:[%s3055_s1 + $0x120] sm:$0xff]  ;;  %v1671_v62 = vld [vmem:[%s3055_s1 + $0x118] sm:$0xff]  ;;  %v561_v3 = vsel %vm556_vm2, %v558_v45, %v560_v1  ;;  %p2316_p3 = pnand %p2315_p2, %p2309_p13 }
  0x23   : > { %1990 = vmatprep.subr.mxu1 %v354_v17  ;;  %1956 = vmatpush3.msra.mxu0 %v1658_v16  ;;  %v1670_v63 = vld [vmem:[%s3055_s1 + $0x110] sm:$0xff]  ;;  %v1669_v0 = vld [vmem:[%s3055_s1 + $0x108] sm:$0xff]  ;;  %v1668_v2 = vld [vmem:[%s3055_s1 + $0x100] sm:$0xff] }
  0x24   : > { %1991 = vmatpush3.msra.mxu1 %v354_v17  ;;  %1957 = vmatprep.subr.mxu0 %v1657_v18  ;;  %v1692_v4 = vld [vmem:[%s3057_s3 + $0x78] sm:$0xff]  ;;  %v1691_v6 = vld [vmem:[%s3057_s3 + $0x70] sm:$0xff]  ;;  %v1690_v8 = vld [vmem:[%s3057_s3 + $0x68] sm:$0xff] }
  0x25   : > { %1992 = vmatprep.subr.mxu1 %v353_v19  ;;  %1958 = vmatpush3.msra.mxu0 %v1657_v18  ;;  %v1704_v5 = vld [vmem:[%s3057_s3 + $0xb8] sm:$0xff]  ;;  %v1703_v7 = vld [vmem:[%s3057_s3 + $0xb0] sm:$0xff]  ;;  %v1702_v9 = vld [vmem:[%s3057_s3 + $0xa8] sm:$0xff] }
  0x26   : > { %1993 = vmatpush3.msra.mxu1 %v353_v19  ;;  %1959 = vmatprep.subr.mxu0 %v1656_v22  ;;  %v1689_v10 = vld [vmem:[%s3057_s3 + $0x60] sm:$0xff]  ;;  %v1688_v12 = vld [vmem:[%s3057_s3 + $0x58] sm:$0xff]  ;;  %v1687_v16 = vld [vmem:[%s3057_s3 + $0x50] sm:$0xff] }
  0x27   : > { %1994 = vmatprep.subr.mxu1 %v352_v23  ;;  %1960 = vmatpush3.msra.mxu0 %v1656_v22  ;;  %v1701_v11 = vld [vmem:[%s3057_s3 + $0xa0] sm:$0xff]  ;;  %v1700_v13 = vld [vmem:[%s3057_s3 + $0x98] sm:$0xff]  ;;  %v1699_v17 = vld [vmem:[%s3057_s3 + $0x90] sm:$0xff] }
  0x28   : > { %1995 = vmatpush3.msra.mxu1 %v352_v23  ;;  %1961 = vmatprep.subr.mxu0 %v1655_v24  ;;  %v1686_v18 = vld [vmem:[%s3057_s3 + $0x48] sm:$0xff]  ;;  %v1685_v20 = vld [vmem:[%s3057_s3 + $0x40] sm:$0xff]  ;;  %v668_v22 = vld [vmem:[%s3057_s3 + $0x38] sm:$0xff] }
  0x29   : > { %1996 = vmatprep.subr.mxu1 %v351_v25  ;;  %1962 = vmatpush3.msra.mxu0 %v1655_v24  ;;  %v1698_v19 = vld [vmem:[%s3057_s3 + $0x88] sm:$0xff]  ;;  %v1697_v21 = vld [vmem:[%s3057_s3 + $0x80] sm:$0xff]  ;;  %v977_v23 = vld [vmem:[%s3059_s5 + $0x78] sm:$0xff] }
  0x2a   : > { %1997 = vmatpush3.msra.mxu1 %v351_v25  ;;  %1963 = vmatprep.subr.mxu0 %v1654_v28  ;;  %v1722_v1 = vld [vmem:[%s3059_s5 + $0xf0] sm:$0xff] }
  0x2b   : > { %1998 = vmatprep.subr.mxu1 %v350_v29  ;;  %1964 = vmatpush3.msra.mxu0 %v1654_v28 }
  0x2c   : > { %1999 = vmatpush3.msra.mxu1 %v350_v29  ;;  %1965 = vmatprep.subr.mxu0 %v1653_v30 }
  0x2d   : > { %2000 = vmatprep.subr.mxu1 %v349_v31  ;;  %1966 = vmatpush3.msra.mxu0 %v1653_v30  ;;  %v1684_v30 = vld [vmem:[%s3056_s2] ss:$0 sm:$0xff] }
  0x2e   : > { %2001 = vmatpush3.msra.mxu1 %v349_v31  ;;  %1967 = vmatprep.subr.mxu0 %v1652_v34 }
  0x2f   : > { %2002 = vmatprep.subr.mxu1 %v348_v35  ;;  %1968 = vmatpush3.msra.mxu0 %v1652_v34 }
  0x30   : > { %2003 = vmatpush3.msra.mxu1 %v348_v35  ;;  %1969 = vmatprep.subr.mxu0 %v1651_v39 }
  0x31   : > { %2004 = vmatprep.subr.mxu1 %v347_v40  ;;  %1970 = vmatpush3.msra.mxu0 %v1651_v39 }
  0x32   : > { %2005 = vmatpush3.msra.mxu1 %v347_v40  ;;  %1971 = vmatprep.subr.mxu0 %v1650_v42 }
  0x33   : > { %2006 = vmatprep.subr.mxu1 %v346_v43  ;;  %1972 = vmatpush3.msra.mxu0 %v1650_v42 }
  0x34   : > { %1973 = vmatprep.mubr.f32.mxu0 %v384_v46  ;;  %2007 = vmatpush3.msra.mxu1 %v346_v43 }
  0x35   : > { %2008 = vmatprep.mubr.msk.f32.mxu1 %vm2588_vm3, %v338_v26  ;;  %1974 = vmatmul.mubr.f32.vlgmr.msra.gmra.mxu0 %v386_v48 }
  0x36   : > { %2009 = vmatmul.mubr.f32.vlgmr.msra.gmra.mxu1 %v2559_v32  ;;  %2011 = vmatprep.subr.mxu0 %v1683_v49 }
  0x37   : > { %2043 = vmatprep.mubr.f32.mxu0 %v559_v50  ;;  %2012 = vmatpush3.msra.mxu0 %v1683_v49 }
  0x38   : > { %2013 = vmatprep.subr.mxu0 %v1682_v51  ;;  %2046 = vmatprep.subr.mxu1 %v1692_v4 }
  0x39   : > { %2014 = vmatpush3.msra.mxu0 %v1682_v51  ;;  %2047 = vmatpush3.msra.mxu1 %v1692_v4  ;;  %v973_v4 = vld [vmem:[%s3059_s5 + $0x58] sm:$0xff] }
  0x3a   : > { %2015 = vmatprep.subr.mxu0 %v1681_v52  ;;  %2048 = vmatprep.subr.mxu1 %v1691_v6 }
  0x3b   : > { %2016 = vmatpush3.msra.mxu0 %v1681_v52  ;;  %2049 = vmatpush3.msra.mxu1 %v1691_v6  ;;  %v972_v6 = vld [vmem:[%s3059_s5 + $0x50] sm:$0xff] }
  0x3c   : > { %2017 = vmatprep.subr.mxu0 %v1680_v53  ;;  %2050 = vmatprep.subr.mxu1 %v1690_v8 }
  0x3d   : > { %2018 = vmatpush3.msra.mxu0 %v1680_v53  ;;  %2051 = vmatpush3.msra.mxu1 %v1690_v8  ;;  %v971_v8 = vld [vmem:[%s3059_s5 + $0x48] sm:$0xff] }
  0x3e   : > { %2019 = vmatprep.subr.mxu0 %v1679_v54  ;;  %2052 = vmatprep.subr.mxu1 %v1689_v10 }
  0x3f   : > { %2020 = vmatpush3.msra.mxu0 %v1679_v54  ;;  %2053 = vmatpush3.msra.mxu1 %v1689_v10  ;;  %v970_v10 = vld [vmem:[%s3059_s5 + $0x40] sm:$0xff] }
  0x40   : > { %2021 = vmatprep.subr.mxu0 %v1678_v55  ;;  %2054 = vmatprep.subr.mxu1 %v1688_v12 }
  0x41   : > { %2022 = vmatpush3.msra.mxu0 %v1678_v55  ;;  %2055 = vmatpush3.msra.mxu1 %v1688_v12  ;;  %v667_v55 = vld [vmem:[%s3057_s3 + $0x30] sm:$0xff]  ;;  %v969_v12 = vld [vmem:[%s3059_s5 + $0x38] sm:$0xff] }
  0x42   : > { %2023 = vmatprep.subr.mxu0 %v1677_v56  ;;  %2056 = vmatprep.subr.mxu1 %v1687_v16 }
  0x43   : > { %2024 = vmatpush3.msra.mxu0 %v1677_v56  ;;  %2057 = vmatpush3.msra.mxu1 %v1687_v16  ;;  %v666_v56 = vld [vmem:[%s3057_s3 + $0x28] sm:$0xff]  ;;  %v968_v16 = vld [vmem:[%s3059_s5 + $0x30] sm:$0xff] }
  0x44   : > { %2025 = vmatprep.subr.mxu0 %v1676_v57  ;;  %2058 = vmatprep.subr.mxu1 %v1686_v18 }
  0x45   : > { %2026 = vmatpush3.msra.mxu0 %v1676_v57  ;;  %2059 = vmatpush3.msra.mxu1 %v1686_v18  ;;  %v665_v57 = vld [vmem:[%s3057_s3 + $0x20] sm:$0xff]  ;;  %v967_v18 = vld [vmem:[%s3059_s5 + $0x28] sm:$0xff] }
  0x46   : > { %2027 = vmatprep.subr.mxu0 %v1675_v58  ;;  %2060 = vmatprep.subr.mxu1 %v1685_v20 }
  0x47   : > { %2028 = vmatpush3.msra.mxu0 %v1675_v58  ;;  %2061 = vmatpush3.msra.mxu1 %v1685_v20  ;;  %v664_v58 = vld [vmem:[%s3057_s3 + $0x18] sm:$0xff]  ;;  %v966_v20 = vld [vmem:[%s3059_s5 + $0x20] sm:$0xff] }
  0x48   : > { %2029 = vmatprep.subr.mxu0 %v1674_v59  ;;  %2065 = vmatprep.subr.mxu1 %v668_v22 }
  0x49   : > { %2030 = vmatpush3.msra.mxu0 %v1674_v59  ;;  %v663_v59 = vld [vmem:[%s3057_s3 + $0x10] sm:$0xff] }
  0x4a   : > { %2031 = vmatprep.subr.mxu0 %v1673_v60 }
  0x4b   : > { %2032 = vmatpush3.msra.mxu0 %v1673_v60  ;;  %v662_v60 = vld [vmem:[%s3057_s3 + $0x8] sm:$0xff] }
  0x4c   : > { %2033 = vmatprep.subr.mxu0 %v1672_v61 }
  0x4d   : > { %2034 = vmatpush3.msra.mxu0 %v1672_v61  ;;  %v661_v61 = vld [vmem:[%s3057_s3] sm:$0xff] }
  0x4e   : > { %2035 = vmatprep.subr.mxu0 %v1671_v62 }
  0x4f   : > { %2036 = vmatpush3.msra.mxu0 %v1671_v62  ;;  %v976_v62 = vld [vmem:[%s3059_s5 + $0x70] sm:$0xff] }
  0x50   : > { %2037 = vmatprep.subr.mxu0 %v1670_v63 }
  0x51   : > { %2038 = vmatpush3.msra.mxu0 %v1670_v63  ;;  %v1723_v63 = vld [vmem:[%s3059_s5 + $0xf8] sm:$0xff] }
  0x52   : > { %2039 = vmatprep.subr.mxu0 %v1669_v0 }
  0x53   : > { %2040 = vmatpush3.msra.mxu0 %v1669_v0  ;;  %v975_v0 = vld [vmem:[%s3059_s5 + $0x68] sm:$0xff] }
  0x54   : > { %2041 = vmatprep.subr.mxu0 %v1668_v2 }
  0x55   : > { %2042 = vmatpush3.msra.mxu0 %v1668_v2  ;;  %v974_v2 = vld [vmem:[%s3059_s5 + $0x60] sm:$0xff] }
  0x56   : > { %2044 = vmatmul.mubr.f32.vlgmr.msra.gmra.mxu0 %v561_v3  ;;  %2084 = vmatprep.subr.mxu0 %v1704_v5  ;;  %v1721_v3 = vld [vmem:[%s3059_s5 + $0xe8] sm:$0xff] }
  0x57   : > { %2085 = vmatpush3.msra.mxu0 %v1704_v5  ;;  %v1720_v5 = vld [vmem:[%s3059_s5 + $0xe0] sm:$0xff] }
  0x58   : > { %2086 = vmatprep.subr.mxu0 %v1703_v7 }
  0x59   : > { %2087 = vmatpush3.msra.mxu0 %v1703_v7  ;;  %v1719_v7 = vld [vmem:[%s3059_s5 + $0xd8] sm:$0xff] }
  0x5a   : > { %2088 = vmatprep.subr.mxu0 %v1702_v9 }
  0x5b   : > { %2089 = vmatpush3.msra.mxu0 %v1702_v9  ;;  %v1718_v9 = vld [vmem:[%s3059_s5 + $0xd0] sm:$0xff] }
  0x5c   : > { %2090 = vmatprep.subr.mxu0 %v1701_v11 }
  0x5d   : > { %2091 = vmatpush3.msra.mxu0 %v1701_v11  ;;  %v1717_v11 = vld [vmem:[%s3059_s5 + $0xc8] sm:$0xff] }
  0x5e   : > { %2092 = vmatprep.subr.mxu0 %v1700_v13 }
  0x5f   : > { %2093 = vmatpush3.msra.mxu0 %v1700_v13  ;;  %v1716_v13 = vld [vmem:[%s3059_s5 + $0xc0] sm:$0xff] }
  0x60   : > { %2094 = vmatprep.subr.mxu0 %v1699_v17 }
  0x61   : > { %2095 = vmatpush3.msra.mxu0 %v1699_v17  ;;  %v1715_v17 = vld [vmem:[%s3059_s5 + $0xb8] sm:$0xff] }
  0x62   : > { %2096 = vmatprep.subr.mxu0 %v1698_v19 }
  0x63   : > { %2097 = vmatpush3.msra.mxu0 %v1698_v19  ;;  %v1714_v19 = vld [vmem:[%s3059_s5 + $0xb0] sm:$0xff] }
  0x64   : > { %2098 = vmatprep.subr.mxu0 %v1697_v21 }
  0x65   : > { %2099 = vmatpush3.msra.mxu0 %v1697_v21  ;;  %v1713_v21 = vld [vmem:[%s3059_s5 + $0xa8] sm:$0xff] }
  0x66   : > { %2138 = vmatprep.subr.mxu0 %v977_v23 }
  0xf5   : > { %v1975_v24 = vpop.f32.mrf.mxu0 }
  0xf6   : > { %v2010_v25 = vpop.f32.mrf.mxu1 }
  0xf7   : > { %v455_v26 = vpop.f32.mrf.mxu0  ;;  %v536_v28 = vadd.f32 %v2010_v25, %v1975_v24  ;;  %v964_v24 = vld [vmem:[%s3059_s5 + $0x10] sm:$0xff]  ;;  %v1711_v25 = vld [vmem:[%s3059_s5 + $0x98] sm:$0xff] }
  0xf8   : > { %v530_v27 = vpop.f32.mrf.mxu1 }
  0xf9   : > { %v531_v31 = vadd.f32 %v530_v27, %v455_v26  ;;  %v963_v26 = vld [vmem:[%s3059_s5 + $0x8] sm:$0xff]  ;;  %v1710_v27 = vld [vmem:[%s3059_s5 + $0x90] sm:$0xff] }
 0x116   : > { %v2045_v29 = vpop.f32.mrf.mxu0 }
 0x117   : > { %v640_v32 = vadd.f32 %v2045_v29, %v536_v28  ;;  %v962_v28 = vld [vmem:[%s3059_s5] sm:$0xff]  ;;  %v1709_v29 = vld [vmem:[%s3059_s5 + $0x88] sm:$0xff] }
 0x118   : > { %v630_v33 = vpop.f32.mrf.mxu0 }
 0x119   : > { %v649_v34 = vadd.f32 %v1684_v30, %v640_v32  ;;  %v639_v35 = vadd.f32 %v630_v33, %v531_v31  ;;  %v1741_v31 = vld [vmem:[%s3059_s5 + $0x178] sm:$0xff] }
 0x11b   : > { %v651_v36 = vmax.f32 %v649_v34, 0.0  ;;  %v648_v37 = vadd.f32 %v1684_v30, %v639_v35  ;;  %v1708_v30 = vld [vmem:[%s3059_s5 + $0x80] sm:$0xff] }
 0x11d   : > { %v655_v38 = vrot.slane %v651_v36, 7  ;;  %v650_v39 = vmax.f32 %v648_v37, 0.0  ;;  %v1707_v37 = vld [vmem:[%s3058_s4] ss:$0 sm:$0xff] }
 0x11f   : > { %v660_v40 = vsel %vm337_vm0, %v655_v38, 0.0  ;;  %v654_v41 = vrot.slane %v650_v39, 7 }
 0x120   : > { %v683_v42 = vrot.slane %v660_v40, 1  ;;  %v856_v43 = vrot.slane %v660_v40, 2 }
 0x121   : > { %v656_v44 = vsel %vm337_vm0, %v654_v41, %v655_v38  ;;  %v659_v45 = vsel %vm337_vm0, 0.0, %v654_v41 }
 0x122   : > { %v680_v46 = vrot.slane %v659_v45, 1  ;;  %v853_v48 = vrot.slane %v659_v45, 2  ;;  %v681_v49 = vrot.slane %v656_v44, 1  ;;  %v854_v50 = vrot.slane %v656_v44, 2 }
 0x124   : > { %v682_v51 = vsel %vm381_vm1, %v680_v46, %v681_v49  ;;  %v855_v52 = vsel %vm556_vm2, %v853_v48, %v854_v50  ;;  %v684_v53 = vsel %vm381_vm1, %v681_v49, %v683_v42  ;;  %v857_v54 = vsel %vm556_vm2, %v854_v50, %v856_v43 }
 0x125   : > { %2062 = vmatprep.mubr.msk.f32.mxu1 %vm685_vm4, %v682_v51  ;;  %2100 = vmatprep.mubr.msk.f32.mxu0 %vm685_vm4, %v855_v52 }
 0x126   : > { %2063 = vmatmul.mubr.msk.f32.vlgmr.msra.gmra.mxu1 %vm685_vm4, %v684_v53  ;;  %2101 = vmatmul.mubr.msk.f32.vlgmr.msra.gmra.mxu0 %vm685_vm4, %v857_v54 }
 0x127   : > { %2066 = vmatpush3.msra.mxu1 %v668_v22  ;;  %2081 = vmatprep.mubr.msk.f32.mxu1 %vm685_vm4, %v659_v45  ;;  %v965_v22 = vld [vmem:[%s3059_s5 + $0x18] sm:$0xff] }
 0x128   : > { %2067 = vmatprep.subr.mxu1 %v667_v55  ;;  %2139 = vmatpush3.msra.mxu0 %v977_v23  ;;  %v1712_v23 = vld [vmem:[%s3059_s5 + $0xa0] sm:$0xff] }
 0x129   : > { %2068 = vmatpush3.msra.mxu1 %v667_v55  ;;  %2140 = vmatprep.subr.mxu0 %v976_v62 }
 0x12a   : > { %2069 = vmatprep.subr.mxu1 %v666_v56  ;;  %2141 = vmatpush3.msra.mxu0 %v976_v62  ;;  %v1738_v62 = vld [vmem:[%s3059_s5 + $0x160] sm:$0xff] }
 0x12b   : > { %2070 = vmatpush3.msra.mxu1 %v666_v56  ;;  %2142 = vmatprep.subr.mxu0 %v975_v0 }
 0x12c   : > { %2071 = vmatprep.subr.mxu1 %v665_v57  ;;  %2143 = vmatpush3.msra.mxu0 %v975_v0  ;;  %v1736_v0 = vld [vmem:[%s3059_s5 + $0x150] sm:$0xff] }
 0x12d   : > { %2072 = vmatpush3.msra.mxu1 %v665_v57  ;;  %2144 = vmatprep.subr.mxu0 %v974_v2 }
 0x12e   : > { %2073 = vmatprep.subr.mxu1 %v664_v58  ;;  %2145 = vmatpush3.msra.mxu0 %v974_v2  ;;  %v1734_v2 = vld [vmem:[%s3059_s5 + $0x140] sm:$0xff] }
 0x12f   : > { %2074 = vmatpush3.msra.mxu1 %v664_v58  ;;  %2146 = vmatprep.subr.mxu0 %v973_v4 }
 0x130   : > { %2075 = vmatprep.subr.mxu1 %v663_v59  ;;  %2147 = vmatpush3.msra.mxu0 %v973_v4  ;;  %v1732_v4 = vld [vmem:[%s3059_s5 + $0x130] sm:$0xff] }
 0x131   : > { %2076 = vmatpush3.msra.mxu1 %v663_v59  ;;  %2148 = vmatprep.subr.mxu0 %v972_v6  ;;  %v1740_v59 = vld [vmem:[%s3059_s5 + $0x170] sm:$0xff] }
 0x132   : > { %2077 = vmatprep.subr.mxu1 %v662_v60  ;;  %2149 = vmatpush3.msra.mxu0 %v972_v6  ;;  %v1730_v6 = vld [vmem:[%s3059_s5 + $0x120] sm:$0xff] }
 0x133   : > { %2078 = vmatpush3.msra.mxu1 %v662_v60  ;;  %2150 = vmatprep.subr.mxu0 %v971_v8 }
 0x134   : > { %2079 = vmatprep.subr.mxu1 %v661_v61  ;;  %2151 = vmatpush3.msra.mxu0 %v971_v8  ;;  %v1728_v8 = vld [vmem:[%s3059_s5 + $0x110] sm:$0xff] }
 0x135   : > { %2080 = vmatpush3.msra.mxu1 %v661_v61  ;;  %2152 = vmatprep.subr.mxu0 %v970_v10  ;;  %v1739_v61 = vld [vmem:[%s3059_s5 + $0x168] sm:$0xff] }
 0x136   : > { %2082 = vmatmul.mubr.msk.f32.vlgmr.msra.gmra.mxu1 %vm685_vm4, %v656_v44  ;;  %2103 = vmatprep.subr.mxu1 %v1723_v63 }
 0x137   : > { %2104 = vmatpush3.msra.mxu1 %v1723_v63  ;;  %2153 = vmatpush3.msra.mxu0 %v970_v10  ;;  %v1737_v63 = vld [vmem:[%s3059_s5 + $0x158] sm:$0xff]  ;;  %v1726_v10 = vld [vmem:[%s3059_s5 + $0x100] sm:$0xff] }
 0x138   : > { %2105 = vmatprep.subr.mxu1 %v1722_v1  ;;  %2154 = vmatprep.subr.mxu0 %v969_v12 }
 0x139   : > { %2106 = vmatpush3.msra.mxu1 %v1722_v1  ;;  %2155 = vmatpush3.msra.mxu0 %v969_v12  ;;  %v1735_v1 = vld [vmem:[%s3059_s5 + $0x148] sm:$0xff] }
 0x13a   : > { %2107 = vmatprep.subr.mxu1 %v1721_v3  ;;  %2156 = vmatprep.subr.mxu0 %v968_v16 }
 0x13b   : > { %2108 = vmatpush3.msra.mxu1 %v1721_v3  ;;  %2157 = vmatpush3.msra.mxu0 %v968_v16  ;;  %v1733_v3 = vld [vmem:[%s3059_s5 + $0x138] sm:$0xff] }
 0x13c   : > { %2109 = vmatprep.subr.mxu1 %v1720_v5  ;;  %2158 = vmatprep.subr.mxu0 %v967_v18  ;;  %v1762_v16 = vld [vmem:[%s3061_s7 + $0xb8] sm:$0xff] }
 0x13d   : > { %2110 = vmatpush3.msra.mxu1 %v1720_v5  ;;  %2159 = vmatpush3.msra.mxu0 %v967_v18  ;;  %v1731_v5 = vld [vmem:[%s3059_s5 + $0x128] sm:$0xff]  ;;  %v1761_v18 = vld [vmem:[%s3061_s7 + $0xb0] sm:$0xff] }
 0x13e   : > { %2111 = vmatprep.subr.mxu1 %v1719_v7  ;;  %2160 = vmatprep.subr.mxu0 %v966_v20 }
 0x13f   : > { %2112 = vmatpush3.msra.mxu1 %v1719_v7  ;;  %2161 = vmatpush3.msra.mxu0 %v966_v20  ;;  %v1729_v7 = vld [vmem:[%s3059_s5 + $0x118] sm:$0xff]  ;;  %v1760_v20 = vld [vmem:[%s3061_s7 + $0xa8] sm:$0xff] }
 0x140   : > { %2113 = vmatprep.subr.mxu1 %v1718_v9  ;;  %2162 = vmatprep.subr.mxu0 %v965_v22 }
 0x141   : > { %2114 = vmatpush3.msra.mxu1 %v1718_v9  ;;  %2163 = vmatpush3.msra.mxu0 %v965_v22  ;;  %v1727_v9 = vld [vmem:[%s3059_s5 + $0x108] sm:$0xff]  ;;  %v1759_v22 = vld [vmem:[%s3061_s7 + $0xa0] sm:$0xff] }
 0x142   : > { %2115 = vmatprep.subr.mxu1 %v1717_v11  ;;  %2164 = vmatprep.subr.mxu0 %v964_v24 }
 0x143   : > { %2116 = vmatpush3.msra.mxu1 %v1717_v11  ;;  %2165 = vmatpush3.msra.mxu0 %v964_v24  ;;  %v1758_v24 = vld [vmem:[%s3061_s7 + $0x98] sm:$0xff] }
 0x144   : > { %2117 = vmatprep.subr.mxu1 %v1716_v13  ;;  %2166 = vmatprep.subr.mxu0 %v963_v26 }
 0x145   : > { %2118 = vmatpush3.msra.mxu1 %v1716_v13  ;;  %2167 = vmatpush3.msra.mxu0 %v963_v26  ;;  %v1750_v13 = vld [vmem:[%s3061_s7 + $0x78] sm:$0xff]  ;;  %v1757_v26 = vld [vmem:[%s3061_s7 + $0x90] sm:$0xff] }
 0x146   : > { %2119 = vmatprep.subr.mxu1 %v1715_v17  ;;  %2168 = vmatprep.subr.mxu0 %v962_v28 }
 0x147   : > { %2120 = vmatpush3.msra.mxu1 %v1715_v17  ;;  %2169 = vmatpush3.msra.mxu0 %v962_v28  ;;  %v1749_v17 = vld [vmem:[%s3061_s7 + $0x70] sm:$0xff]  ;;  %v1756_v28 = vld [vmem:[%s3061_s7 + $0x88] sm:$0xff] }
 0x148   : > { %2121 = vmatprep.subr.mxu1 %v1714_v19  ;;  %2208 = vmatprep.subr.mxu0 %v1750_v13 }
 0x149   : > { %2122 = vmatpush3.msra.mxu1 %v1714_v19  ;;  %v1748_v19 = vld [vmem:[%s3061_s7 + $0x68] sm:$0xff] }
 0x14a   : > { %2123 = vmatprep.subr.mxu1 %v1713_v21 }
 0x14b   : > { %2124 = vmatpush3.msra.mxu1 %v1713_v21  ;;  %v1747_v21 = vld [vmem:[%s3061_s7 + $0x60] sm:$0xff] }
 0x14c   : > { %2125 = vmatprep.subr.mxu1 %v1712_v23 }
 0x14d   : > { %2126 = vmatpush3.msra.mxu1 %v1712_v23  ;;  %v1746_v23 = vld [vmem:[%s3061_s7 + $0x58] sm:$0xff] }
 0x14e   : > { %2127 = vmatprep.subr.mxu1 %v1711_v25 }
 0x14f   : > { %2128 = vmatpush3.msra.mxu1 %v1711_v25  ;;  %v1745_v25 = vld [vmem:[%s3061_s7 + $0x50] sm:$0xff] }
 0x150   : > { %2129 = vmatprep.subr.mxu1 %v1710_v27 }
 0x151   : > { %2130 = vmatpush3.msra.mxu1 %v1710_v27  ;;  %v1744_v27 = vld [vmem:[%s3061_s7 + $0x48] sm:$0xff] }
 0x152   : > { %2131 = vmatprep.subr.mxu1 %v1709_v29 }
 0x153   : > { %2132 = vmatpush3.msra.mxu1 %v1709_v29  ;;  %v1743_v29 = vld [vmem:[%s3061_s7 + $0x40] sm:$0xff] }
 0x154   : > { %2133 = vmatprep.subr.mxu1 %v1708_v30 }
 0x155   : > { %2134 = vmatpush3.msra.mxu1 %v1708_v30  ;;  %v1755_v30 = vld [vmem:[%s3061_s7 + $0x80] sm:$0xff] }
 0x156   : > { %2173 = vmatprep.subr.mxu1 %v1741_v31 }
 0x1e6   : > { %v2064_v32 = vpop.f32.mrf.mxu1  ;;  %v2102_v34 = vpop.f32.mrf.mxu0 }
 0x1e8   : > { %v756_v33 = vpop.f32.mrf.mxu1  ;;  %v928_v41 = vpop.f32.mrf.mxu0 }
 0x1f6   : > { %v2083_v35 = vpop.f32.mrf.mxu1 }
 0x1f7   : > { %v841_v36 = vadd.f32 %v2083_v35, %v2064_v32 }
 0x1f8   : > { %v835_v38 = vpop.f32.mrf.mxu1 }
 0x1f9   : > { %v938_v39 = vadd.f32 %v2102_v34, %v841_v36  ;;  %v836_v40 = vadd.f32 %v835_v38, %v756_v33  ;;  %v1742_v38 = vld [vmem:[%s3060_s6] ss:$0 sm:$0xff] }
 0x1fb   : > { %v947_v42 = vadd.f32 %v1707_v37, %v938_v39  ;;  %v937_v43 = vadd.f32 %v928_v41, %v836_v40 }
 0x1fd   : > { %v2842_v44 = vadd.f32 %v947_v42, %v2518_v15  ;;  %v946_v45 = vadd.f32 %v1707_v37, %v937_v43 }
 0x1ff   : > { %v2845_v46 = vadd.f32 %v946_v45, %v2516_v14  ;;  %v951_v48 = vmax.f32 %v2842_v44, 0.0 }
 0x201   : > { %v950_v49 = vmax.f32 %v2845_v46, 0.0  ;;  %v955_v50 = vrot.slane %v951_v48, 7 }
 0x203   : > { %v954_v51 = vrot.slane %v950_v49, 7  ;;  %v2850_v52 = vsel %vm337_vm0, %v955_v50, 0.0 }
 0x204   : > { %v1000_v14 = vrot.slane %v2850_v52, 1  ;;  %v1174_v11 = vrot.slane %v2850_v52, 2 }
 0x205   : > { %2170 = vmatprep.mubr.msk.f32.mxu0 %vm2588_vm3, %v954_v51  ;;  %v2855_v53 = vsel %vm337_vm0, %v954_v51, %v955_v50  ;;  %v960_v15 = vsel %vm337_vm0, 0.0, %v954_v51 }
 0x206   : > { %v998_v54 = vrot.slane %v2855_v53, 1  ;;  %2171 = vmatmul.mubr.f32.vlgmr.msra.gmra.mxu0 %v2855_v53  ;;  %v1172_v55 = vrot.slane %v2855_v53, 2  ;;  %v997_v56 = vrot.slane %v960_v15, 1  ;;  %v1171_v57 = vrot.slane %v960_v15, 2 }
 0x207   : > { %2209 = vmatpush3.msra.mxu0 %v1750_v13 }
 0x208   : > { %v999_v58 = vsel %vm381_vm1, %v997_v56, %v998_v54  ;;  %v1001_v47 = vsel %vm381_vm1, %v998_v54, %v1000_v14  ;;  %v1173_v60 = vsel %vm556_vm2, %v1171_v57, %v1172_v55  ;;  %v1175_v12 = vsel %vm556_vm2, %v1172_v55, %v1174_v11  ;;  %2210 = vmatprep.subr.mxu0 %v1749_v17 }
 0x209   : > { %2135 = vmatprep.mubr.f32.mxu1 %v999_v58  ;;  %2211 = vmatpush3.msra.mxu0 %v1749_v17 }
 0x20a   : > { %2136 = vmatmul.mubr.f32.vlgmr.msra.gmra.mxu1 %v1001_v47  ;;  %2212 = vmatprep.subr.mxu0 %v1748_v19 }
 0x20b   : > { %2174 = vmatpush3.msra.mxu1 %v1741_v31  ;;  %2205 = vmatprep.mubr.f32.mxu1 %v1173_v60  ;;  %v1282_v31 = vld [vmem:[%s3061_s7 + $0x38] sm:$0xff] }
 0x20c   : > { %2175 = vmatprep.subr.mxu1 %v1740_v59  ;;  %2213 = vmatpush3.msra.mxu0 %v1748_v19 }
 0x20d   : > { %2176 = vmatpush3.msra.mxu1 %v1740_v59  ;;  %2214 = vmatprep.subr.mxu0 %v1747_v21 }
 0x20e   : > { %2177 = vmatprep.subr.mxu1 %v1739_v61  ;;  %2215 = vmatpush3.msra.mxu0 %v1747_v21 }
 0x20f   : > { %2178 = vmatpush3.msra.mxu1 %v1739_v61  ;;  %2216 = vmatprep.subr.mxu0 %v1746_v23 }
 0x210   : > { %2179 = vmatprep.subr.mxu1 %v1738_v62  ;;  %2217 = vmatpush3.msra.mxu0 %v1746_v23 }
 0x211   : > { %2180 = vmatpush3.msra.mxu1 %v1738_v62  ;;  %2218 = vmatprep.subr.mxu0 %v1745_v25  ;;  %v1281_v62 = vld [vmem:[%s3061_s7 + $0x30] sm:$0xff] }
 0x212   : > { %2181 = vmatprep.subr.mxu1 %v1737_v63  ;;  %2219 = vmatpush3.msra.mxu0 %v1745_v25 }
 0x213   : > { %2182 = vmatpush3.msra.mxu1 %v1737_v63  ;;  %2220 = vmatprep.subr.mxu0 %v1744_v27  ;;  %v1280_v63 = vld [vmem:[%s3061_s7 + $0x28] sm:$0xff] }
 0x214   : > { %2183 = vmatprep.subr.mxu1 %v1736_v0  ;;  %2221 = vmatpush3.msra.mxu0 %v1744_v27 }
 0x215   : > { %2184 = vmatpush3.msra.mxu1 %v1736_v0  ;;  %2222 = vmatprep.subr.mxu0 %v1743_v29  ;;  %v1279_v0 = vld [vmem:[%s3061_s7 + $0x20] sm:$0xff] }
 0x216   : > { %2185 = vmatprep.subr.mxu1 %v1735_v1  ;;  %2223 = vmatpush3.msra.mxu0 %v1743_v29 }
 0x217   : > { %2186 = vmatpush3.msra.mxu1 %v1735_v1  ;;  %2227 = vmatprep.subr.mxu0 %v1282_v31  ;;  %v1278_v1 = vld [vmem:[%s3061_s7 + $0x18] sm:$0xff] }
 0x218   : > { %2187 = vmatprep.subr.mxu1 %v1734_v2 }
 0x219   : > { %2188 = vmatpush3.msra.mxu1 %v1734_v2  ;;  %v1277_v2 = vld [vmem:[%s3061_s7 + $0x10] sm:$0xff] }
 0x21a   : > { %2189 = vmatprep.subr.mxu1 %v1733_v3 }
 0x21b   : > { %2190 = vmatpush3.msra.mxu1 %v1733_v3  ;;  %v1276_v3 = vld [vmem:[%s3061_s7 + $0x8] sm:$0xff] }
 0x21c   : > { %2191 = vmatprep.subr.mxu1 %v1732_v4 }
 0x21d   : > { %2192 = vmatpush3.msra.mxu1 %v1732_v4  ;;  %v1275_v4 = vld [vmem:[%s3061_s7] sm:$0xff] }
 0x21e   : > { %2193 = vmatprep.subr.mxu1 %v1731_v5 }
 0x21f   : > { %2194 = vmatpush3.msra.mxu1 %v1731_v5 }
 0x220   : > { %2195 = vmatprep.subr.mxu1 %v1730_v6 }
 0x221   : > { %2196 = vmatpush3.msra.mxu1 %v1730_v6 }
 0x222   : > { %2197 = vmatprep.subr.mxu1 %v1729_v7 }
 0x223   : > { %2198 = vmatpush3.msra.mxu1 %v1729_v7 }
 0x224   : > { %2199 = vmatprep.subr.mxu1 %v1728_v8 }
 0x225   : > { %2200 = vmatpush3.msra.mxu1 %v1728_v8 }
 0x226   : > { %2201 = vmatprep.subr.mxu1 %v1727_v9 }
 0x227   : > { %2202 = vmatpush3.msra.mxu1 %v1727_v9 }
 0x228   : > { %2203 = vmatprep.subr.mxu1 %v1726_v10 }
 0x229   : > { %2204 = vmatpush3.msra.mxu1 %v1726_v10  ;;  %v1765_v10 = vld [vmem:[%s3062_s8] ss:$0 sm:$0xff] }
 0x22a   : > { %2206 = vmatmul.mubr.f32.vlgmr.msra.gmra.mxu1 %v1175_v12  ;;  %2246 = vmatprep.subr.mxu1 %v1762_v16 }
 0x22b   : > { %2247 = vmatpush3.msra.mxu1 %v1762_v16 }
 0x22c   : > { %2248 = vmatprep.subr.mxu1 %v1761_v18 }
 0x22d   : > { %2249 = vmatpush3.msra.mxu1 %v1761_v18 }
 0x22e   : > { %2250 = vmatprep.subr.mxu1 %v1760_v20 }
 0x22f   : > { %2251 = vmatpush3.msra.mxu1 %v1760_v20 }
 0x230   : > { %2252 = vmatprep.subr.mxu1 %v1759_v22 }
 0x231   : > { %2253 = vmatpush3.msra.mxu1 %v1759_v22 }
 0x232   : > { %2254 = vmatprep.subr.mxu1 %v1758_v24 }
 0x233   : > { %2255 = vmatpush3.msra.mxu1 %v1758_v24 }
 0x234   : > { %2256 = vmatprep.subr.mxu1 %v1757_v26 }
 0x235   : > { %2257 = vmatpush3.msra.mxu1 %v1757_v26 }
 0x236   : > { %2258 = vmatprep.subr.mxu1 %v1756_v28 }
 0x237   : > { %2259 = vmatpush3.msra.mxu1 %v1756_v28 }
 0x238   : > { %2260 = vmatprep.subr.mxu1 %v1755_v30 }
 0x239   : > { %2261 = vmatpush3.msra.mxu1 %v1755_v30 }
 0x2c6   : > { %v2172_v33 = vpop.f32.mrf.mxu0 }
 0x2c8   : > { %v1145_v36 = vpop.f32.mrf.mxu0 }
 0x2ca   : > { %v2137_v32 = vpop.f32.mrf.mxu1 }
 0x2cb   : > { %v1151_v35 = vadd.f32 %v2172_v33, %v2137_v32 }
 0x2cc   : > { %v1070_v34 = vpop.f32.mrf.mxu1 }
 0x2cd   : > { %v1146_v39 = vadd.f32 %v1145_v36, %v1070_v34 }
 0x2ea   : > { %v2207_v37 = vpop.f32.mrf.mxu1 }
 0x2eb   : > { %v1254_v40 = vadd.f32 %v2207_v37, %v1151_v35 }
 0x2ec   : > { %v1244_v41 = vpop.f32.mrf.mxu1 }
 0x2ed   : > { %v1263_v42 = vadd.f32 %v1742_v38, %v1254_v40  ;;  %v1253_v43 = vadd.f32 %v1244_v41, %v1146_v39 }
 0x2ef   : > { %v1265_v45 = vmax.f32 %v1263_v42, 0.0  ;;  %v1262_v48 = vadd.f32 %v1742_v38, %v1253_v43 }
 0x2f1   : > { %v1269_v49 = vrot.slane %v1265_v45, 7  ;;  %v1264_v50 = vmax.f32 %v1262_v48, 0.0 }
 0x2f3   : > { %v1274_v51 = vsel %vm337_vm0, %v1269_v49, 0.0  ;;  %v1268_v52 = vrot.slane %v1264_v50, 7 }
 0x2f4   : > { %v1297_v53 = vrot.slane %v1274_v51, 1  ;;  %v1469_v15 = vrot.slane %v1274_v51, 2 }
 0x2f5   : > { %v1270_v14 = vsel %vm337_vm0, %v1268_v52, %v1269_v49  ;;  %v1273_v54 = vsel %vm337_vm0, 0.0, %v1268_v52 }
 0x2f6   : > { %v1294_v55 = vrot.slane %v1273_v54, 1  ;;  %v1466_v56 = vrot.slane %v1273_v54, 2  ;;  %v1295_v57 = vrot.slane %v1270_v14, 1  ;;  %v1467_v58 = vrot.slane %v1270_v14, 2 }
 0x2f8   : > { %v1296_v47 = vsel %vm381_vm1, %v1294_v55, %v1295_v57  ;;  %v1468_v59 = vsel %vm556_vm2, %v1466_v56, %v1467_v58  ;;  %v1298_v60 = vsel %vm381_vm1, %v1295_v57, %v1297_v53  ;;  %v1470_v61 = vsel %vm556_vm2, %v1467_v58, %v1469_v15 }
 0x2f9   : > { %2224 = vmatprep.mubr.msk.f32.mxu0 %vm685_vm4, %v1296_v47  ;;  %2262 = vmatprep.mubr.msk.f32.mxu1 %vm685_vm4, %v1468_v59 }
 0x2fa   : > { %2225 = vmatmul.mubr.msk.f32.vlgmr.msra.gmra.mxu0 %vm685_vm4, %v1298_v60  ;;  %2263 = vmatmul.mubr.msk.f32.vlgmr.msra.gmra.mxu1 %vm685_vm4, %v1470_v61 }
 0x2fb   : > { %2228 = vmatpush3.msra.mxu0 %v1282_v31  ;;  %2243 = vmatprep.mubr.msk.f32.mxu0 %vm685_vm4, %v1273_v54 }
 0x2fc   : > { %2229 = vmatprep.subr.mxu0 %v1281_v62 }
 0x2fd   : > { %2230 = vmatpush3.msra.mxu0 %v1281_v62 }
 0x2fe   : > { %2231 = vmatprep.subr.mxu0 %v1280_v63 }
 0x2ff   : > { %2232 = vmatpush3.msra.mxu0 %v1280_v63 }
 0x300   : > { %2233 = vmatprep.subr.mxu0 %v1279_v0 }
 0x301   : > { %2234 = vmatpush3.msra.mxu0 %v1279_v0 }
 0x302   : > { %2235 = vmatprep.subr.mxu0 %v1278_v1 }
 0x303   : > { %2236 = vmatpush3.msra.mxu0 %v1278_v1 }
 0x304   : > { %2237 = vmatprep.subr.mxu0 %v1277_v2 }
 0x305   : > { %2238 = vmatpush3.msra.mxu0 %v1277_v2 }
 0x306   : > { %2239 = vmatprep.subr.mxu0 %v1276_v3 }
 0x307   : > { %2240 = vmatpush3.msra.mxu0 %v1276_v3 }
 0x308   : > { %2241 = vmatprep.subr.mxu0 %v1275_v4 }
 0x309   : > { %2242 = vmatpush3.msra.mxu0 %v1275_v4 }
 0x30a   : > { %2244 = vmatmul.mubr.msk.f32.vlgmr.msra.gmra.mxu0 %vm685_vm4, %v1270_v14 }
 0x3ba   : > { %v2226_v5 = vpop.f32.mrf.mxu0  ;;  %v2264_v7 = vpop.f32.mrf.mxu1 }
 0x3bc   : > { %v1369_v6 = vpop.f32.mrf.mxu0  ;;  %v1541_v16 = vpop.f32.mrf.mxu1 }
 0x3ca   : > { %v2245_v8 = vpop.f32.mrf.mxu0 }
 0x3cb   : > { %v1454_v9 = vadd.f32 %v2245_v8, %v2226_v5 }
 0x3cc   : > { %v1448_v11 = vpop.f32.mrf.mxu0 }
 0x3cd   : > { %v1551_v12 = vadd.f32 %v2264_v7, %v1454_v9  ;;  %v1449_v13 = vadd.f32 %v1448_v11, %v1369_v6 }
 0x3cf   : > { %v1560_v17 = vadd.f32 %v1765_v10, %v1551_v12  ;;  %v1550_v18 = vadd.f32 %v1541_v16, %v1449_v13 }
 0x3d1   : > { %v1562_v19 = vadd.f32 %v1560_v17, %v2842_v44  ;;  %v1559_v20 = vadd.f32 %v1765_v10, %v1550_v18 }
 0x3d3   : > { %v1564_v21 = vmax.f32 %v1562_v19, 0.0  ;;  %v1561_v22 = vadd.f32 %v1559_v20, %v2845_v46 }
 0x3d5   : > { %1566 = vst [vmem:[%s325_s25 + $0x8] sm:$0xff] %v1564_v21  ;;  %v1563_v23 = vmax.f32 %v1561_v22, 0.0 }
 0x3d7   : > { %1565 = vst [vmem:[%s325_s25] sm:$0xff] %v1563_v23 }
 0x3d8   : > { %2319 = shalt.err (!%p2316_p3)
}
 0x3d9   : > { %s2320_s17 = scalar_lea.hbm %s3010_s14, 256  ;;  %s2324_s25 = scalar_lea.hbm %s3063_s9, 512 }
 0x3da   : > { %p2321_p4 = scmp.ne.s32.totalorder %s3010_s14, %s2320_s17  ;;  %p2325_p9 = scmp.lt.s32.totalorder %s3010_s14, %s3063_s9 }
 0x3db   : > { %p2326_p10 = scmp.lt.s32.totalorder %s2324_s25, %s2320_s17 }
 0x3dc   : > { %p2322_p7 = pnand %p2321_p4, %p2459_p5 }
 0x3dd   : > { %p2327_p11 = por %p2326_p10, %p2325_p9 }
 0x3de   : > { %p2323_p8 = pneg %p2322_p7 }
 0x3e0   : > { %p2328_p12 = pnand %p2327_p11, %p2323_p8 }
 0x3e2   : > { %2331 = shalt.err (!%p2328_p12)
}
 0x3e3   : > { %s2369_s13 = smov 128   ;;  %s2370_s16 = smov 8  }
 0x3e4   : > { %2265 = dma.vmem_to_hbm [thread:$0]  (%p2459_p5), %s3012_s27, 256, %s3010_s14, %s3014_s26, %s2369_s13, %s2369_s13, %s2370_s16  }
 0x3e5 PF: > { %p2271_p13 = scmp.ge.s32.totalorder %s2366_s12, 2  ;;  %s1596_s22 = sand.u32 1, %s2354_s30  }
 0x3e6   : > { %s1597_s21 = scalar_lea.sflag [#allocation3], %s1596_s22 }
 0x3e7   : > { %p2268_p0 = pnand %p2271_p13, %p2463_p6 }
 0x3e9   : > { %p2269_p1 = pneg %p2268_p0 }
 0x3eb   : > { %2349 = dma.done.wait (%p2269_p1), %s1597_s21, 256  }
 0x3ec   : > { %2351 = vsyncadd (%p2269_p1), %s1597_s21, 4294967040  ;;  %p19_p2 = scmp.ge.s32.totalorder %s2446_s15, 4   ;;  %s3068_s30 = smov %s2358_s10 }
 0x3ed   : > { %s3069_s10 = smov %s2362_s11  ;;  %s3070_s11 = smov %s2457_s18 }
 0x3ee   : > { %s3071_s12 = smov %s2446_s15  ;;  %21 = sbr.rel (!%p19_p2) target bundleno = 3 (0x3), region = 99 }
 0x3f3   :  { %1602 = vsyncpa [#allocation3], 1 }
 0x3f4   :  { %1604 = vsyncpa [#allocation3 + $0x1], 1 }

</bundles_post_ra>
